<compile_context>
chip_gen: v7x
topology: tpu7x:2x2x1
jax: 0.10.0
libtpu: 0.0.40
codegen_flags: <defaults>
</compile_context>

<pallas_src>
import math

import jax
import jax.numpy as jnp
from jax.experimental import pallas as pl
from jax.experimental.pallas import tpu as pltpu  # noqa: F401  (real-size TODO path)

# ---- small Llama config (synthetic) ----
B, S, H = 2, 8, 32          # batch, seq_len, hidden_size
NH, NKV = 4, 2              # num_attention_heads, num_key_value_heads
D = H // NH                 # head_dim = 8
GROUPS = NH // NKV          # key/value groups = 2
I = 64                      # intermediate_size
EPS = 1e-6
ROPE_BASE = 10000.0

R = B * S                   # flattened activation rows = 16
QKW = (NH + NKV) * D        # rotary-active (q|k) columns of merged qkv = 48
NEG_INF = -1e30

# bf16 operands are MXU-native on v5e/v6e/v7x; accumulation stays f32.
MATMUL_DTYPE = jnp.bfloat16


# ----------------------------- fused kernel ---------------------------------

def _rms_norm(x, w):
    var = jnp.mean(x * x, axis=-1, keepdims=True)
    return (x * jax.lax.rsqrt(var + EPS)) * w


def _mm(a, b):
    return jnp.dot(a.astype(MATMUL_DTYPE), b.astype(MATMUL_DTYPE),
                   preferred_element_type=jnp.float32)


def fused_decoder_kernel(x_ref, mask_ref, ln1_ref, ln2_ref, wqkv_ref, wo_ref,
                         wgu_ref, wd_ref, rot_ref, cos_ref, sin_ref, o_ref):
    x = x_ref[...].astype(jnp.float32)                        # (R, H)

    # ---------------- self-attention block ----------------
    h1 = _rms_norm(x, ln1_ref[...].astype(jnp.float32))
    qkv = _mm(h1, wqkv_ref[...])                              # (R, 64); q cols pre-scaled by 1/sqrt(D)

    # RoPE on the q|k columns in one shot.  rotate_half == qk @ rot (block-
    # diagonal +/-1 permutation built in the wrapper); cos/sin arrive pre-tiled
    # per head, so this is 1 tiny matmul + 2 VPU multiplies, no relayouts.
    qk = qkv[:, :QKW]                                         # (R, 48)
    qk = qk * cos_ref[...] + _mm(qk, rot_ref[...]) * sin_ref[...]

    mask = mask_ref[...].astype(jnp.float32)                  # (R, R) additive
    wo = wo_ref[...]                                          # (H, H) bf16

    # GQA attention: loop kv heads, reuse each K/V tile across its GROUPS query
    # heads; accumulate the O-projection per head (no fold/unfold concats).
    attn = jnp.zeros((R, H), jnp.float32)
    for kvh in range(NKV):
        k_h = qk[:, NH * D + kvh * D: NH * D + (kvh + 1) * D].astype(MATMUL_DTYPE)
        v_h = qkv[:, QKW + kvh * D: QKW + (kvh + 1) * D].astype(MATMUL_DTYPE)
        for g in range(GROUPS):
            hh = kvh * GROUPS + g
            q_h = qk[:, hh * D:(hh + 1) * D].astype(MATMUL_DTYPE)
            s = jax.lax.dot_general(q_h, k_h, (((1,), (1,)), ((), ())),
                                    preferred_element_type=jnp.float32) + mask
            s = s - jnp.max(s, axis=-1, keepdims=True)
            e = jnp.exp(s)
            p = e / jnp.sum(e, axis=-1, keepdims=True)        # exact (f32) softmax
            ctx = jnp.dot(p.astype(MATMUL_DTYPE), v_h,
                          preferred_element_type=jnp.float32)             # (R, D)
            attn = attn + jnp.dot(ctx.astype(MATMUL_DTYPE),
                                  wo[hh * D:(hh + 1) * D, :],
                                  preferred_element_type=jnp.float32)     # (R, H)

    hidden = x + attn                                         # residual fused

    # ---------------- MLP block ----------------
    h2 = _rms_norm(hidden, ln2_ref[...].astype(jnp.float32))
    gu = _mm(h2, wgu_ref[...])                                # (R, 2I) = (16, 128) lane-dense
    g = gu[:, :I]
    u = gu[:, I:]
    act = (g * jax.nn.sigmoid(g)) * u                         # SiLU(gate) * up, f32
    out = hidden + _mm(act, wd_ref[...])                      # residual fused

    o_ref[...] = out.astype(o_ref.dtype)


# ----------------------------- wrapper ---------------------------------------

def rope_cos_sin(position_ids):
    inv_freq = 1.0 / (ROPE_BASE ** (jnp.arange(0, D, 2, dtype=jnp.float32) / D))
    freqs = position_ids.astype(jnp.float32)[:, :, None] * inv_freq[None, None, :]
    emb = jnp.concatenate([freqs, freqs], axis=-1)            # (B, S, D)
    return jnp.cos(emb), jnp.sin(emb)


def rotate_half_matrix():
    """Right-multiplication matrix so qk @ rot == rotate_half(qk) per head."""
    half = D // 2
    p = jnp.zeros((D, D), jnp.float32)
    p = p.at[jnp.arange(half), jnp.arange(half) + half].set(1.0)     # y[j>=half] =  x[j-half]
    p = p.at[jnp.arange(half) + half, jnp.arange(half)].set(-1.0)    # y[j<half]  = -x[j+half]
    return jnp.kron(jnp.eye(NH + NKV, dtype=jnp.float32), p)         # (QKW, QKW) block-diag


@jax.jit
def decoder_layer(params, x, attn_mask, position_ids):
    # cos/sin pre-tiled per head in XLA (fused into their computation, free).
    cos, sin = rope_cos_sin(position_ids)
    cos_t = jnp.tile(cos.reshape(R, D), (1, NH + NKV)).astype(jnp.float32)
    sin_t = jnp.tile(sin.reshape(R, D), (1, NH + NKV)).astype(jnp.float32)

    # Combined (R, R) additive mask built in XLA: user-supplied additive mask on
    # the per-batch diagonal blocks, cross-batch blocks forbidden.
    rows = jnp.arange(R)
    full_mask = jnp.where((rows[:, None] // S) == (rows[None, :] // S), 0.0, NEG_INF)
    am = attn_mask.reshape(B, S, S).astype(jnp.float32)
    eye_b = jnp.eye(B, dtype=jnp.float32)
    full_mask = full_mask + jnp.einsum("bc,bij->bicj", eye_b, am).reshape(R, R)

    out2d = pl.pallas_call(
        fused_decoder_kernel,
        out_shape=jax.ShapeDtypeStruct((R, H), x.dtype),
    )(x.reshape(R, H), full_mask.astype(jnp.float32),
      params["ln1_w"].reshape(1, H), params["ln2_w"].reshape(1, H),
      params["wqkv"], params["wo"], params["wgu"], params["wd"],
      params["rot"], cos_t, sin_t)
    return out2d.reshape(B, S, H)


# ----------------------------- pure-JAX reference ----------------------------

def ref_decoder(params, x, attn_mask, position_ids):
    def rms(y, w):
        v = jnp.mean(y.astype(jnp.float32) ** 2, axis=-1, keepdims=True)
        return w * (y.astype(jnp.float32) * jax.lax.rsqrt(v + EPS)).astype(y.dtype)

    def rotate_half(y):
        y1, y2 = y[..., : D // 2], y[..., D // 2:]
        return jnp.concatenate([-y2, y1], axis=-1)

    residual = x
    h = rms(x, params["ln1_w"])
    q = (h @ params["wq"]).reshape(B, S, NH, D).transpose(0, 2, 1, 3)
    k = (h @ params["wk"]).reshape(B, S, NKV, D).transpose(0, 2, 1, 3)
    v = (h @ params["wv"]).reshape(B, S, NKV, D).transpose(0, 2, 1, 3)
    cos, sin = rope_cos_sin(position_ids)
    cos, sin = cos[:, None], sin[:, None]
    q = q * cos + rotate_half(q) * sin
    k = k * cos + rotate_half(k) * sin
    k = jnp.repeat(k, GROUPS, axis=1)
    v = jnp.repeat(v, GROUPS, axis=1)
    w = jnp.einsum("bhqd,bhkd->bhqk", q, k) / jnp.sqrt(jnp.float32(D))
    w = jax.nn.softmax(w + attn_mask, axis=-1)
    o = jnp.einsum("bhqk,bhkd->bhqd", w, v).transpose(0, 2, 1, 3).reshape(B, S, H)
    x = residual + o @ params["wo"]

    residual = x
    h = rms(x, params["ln2_w"])
    g = h @ params["wg"]
    u = h @ params["wu"]
    m = (jax.nn.silu(g) * u) @ params["wd"]
    return residual + m


# ----------------------------- main ------------------------------------------

if __name__ == "__main__":
    kx, kp = jax.random.split(jax.random.PRNGKey(0))
    keys = jax.random.split(kp, 9)

    def init_w(key, shape, fan_in):
        return jax.random.normal(key, shape, jnp.float32) / math.sqrt(fan_in)

    wq = init_w(keys[0], (H, NH * D), H)
    wk = init_w(keys[1], (H, NKV * D), H)
    wv = init_w(keys[2], (H, NKV * D), H)
    wo = init_w(keys[3], (H, H), H)
    wg = init_w(keys[4], (H, I), H)
    wu = init_w(keys[5], (H, I), H)
    wd = init_w(keys[6], (I, H), I)
    ln1 = 1.0 + 0.1 * jax.random.normal(keys[7], (H,), jnp.float32)
    ln2 = 1.0 + 0.1 * jax.random.normal(keys[8], (H,), jnp.float32)

    inv_sqrt_d = 1.0 / math.sqrt(D)   # 1/sqrt(head_dim) folded into wq here
    params = {
        "wqkv": jnp.concatenate([wq * inv_sqrt_d, wk, wv], axis=1).astype(MATMUL_DTYPE),
        "wgu": jnp.concatenate([wg, wu], axis=1).astype(MATMUL_DTYPE),
        "wo": wo.astype(MATMUL_DTYPE),
        "wd": wd.astype(MATMUL_DTYPE),
        "rot": rotate_half_matrix().astype(MATMUL_DTYPE),
        "ln1_w": ln1, "ln2_w": ln2,
    }
    ref_params = {"wq": wq, "wk": wk, "wv": wv, "wo": wo,
                  "wg": wg, "wu": wu, "wd": wd, "ln1_w": ln1, "ln2_w": ln2}

    x = jax.random.normal(kx, (B, S, H), jnp.float32)
    position_ids = jnp.broadcast_to(jnp.arange(S, dtype=jnp.int32)[None, :], (B, S))

    # standard causal additive mask (what the server passes to the layer)
    causal = jnp.tril(jnp.ones((S, S), jnp.float32))
    attn_mask = jnp.where(causal == 1.0, 0.0, -1e9)[None, None].repeat(B, axis=0)

    out = decoder_layer(params, x, attn_mask, position_ids)
    out = jax.block_until_ready(out)

    ref = ref_decoder(ref_params, x, attn_mask, position_ids)

    assert out.shape == (B, S, H)
    # bf16 matmul operands (f32 accumulation) bound agreement with the full-f32
    # reference to ~1-2% across the fused layer; semantic bugs would show as O(1).
    assert jnp.allclose(out, ref, atol=4e-2, rtol=4e-2), "mismatch vs. reference"

    print("KERNEL_OK")
</pallas_src>

<mosaic_0001>
module attributes {stable_mosaic.version = 11 : i64} {
  func.func @fused_decoder_kernel(%arg0: memref<16x32xf32, #tpu.memory_space<vmem>>, %arg1: memref<16x16xf32, #tpu.memory_space<vmem>>, %arg2: memref<1x32xf32, #tpu.memory_space<vmem>>, %arg3: memref<1x32xf32, #tpu.memory_space<vmem>>, %arg4: memref<32x64xbf16, #tpu.memory_space<vmem>>, %arg5: memref<32x32xbf16, #tpu.memory_space<vmem>>, %arg6: memref<32x128xbf16, #tpu.memory_space<vmem>>, %arg7: memref<64x32xbf16, #tpu.memory_space<vmem>>, %arg8: memref<48x48xbf16, #tpu.memory_space<vmem>>, %arg9: memref<16x48xf32, #tpu.memory_space<vmem>>, %arg10: memref<16x48xf32, #tpu.memory_space<vmem>>, %arg11: memref<16x32xf32, #tpu.memory_space<vmem>>) attributes {dimension_semantics = [], scalar_prefetch = 0 : i64, scratch_operands = 0 : i64, tpu.core_type = #tpu.core_type<tc>} {
    %c0 = arith.constant 0 : index
    %c0_0 = arith.constant 0 : index
    %0 = vector.load %arg0[%c0, %c0_0] : memref<16x32xf32, #tpu.memory_space<vmem>>, vector<16x32xf32>
    %c0_1 = arith.constant 0 : index
    %c0_2 = arith.constant 0 : index
    %1 = vector.load %arg2[%c0_1, %c0_2] : memref<1x32xf32, #tpu.memory_space<vmem>>, vector<1x32xf32>
    %2 = arith.mulf %0, %0 : vector<16x32xf32>
    %cst = arith.constant dense<0.000000e+00> : vector<16xf32>
    %3 = vector.multi_reduction <add>, %2, %cst [1] : vector<16x32xf32> to vector<16xf32>
    %4 = vector.shape_cast %3 : vector<16xf32> to vector<16x1xf32>
    %cst_3 = arith.constant 3.200000e+01 : f32
    %5 = vector.broadcast %cst_3 : f32 to vector<16x1xf32>
    %6 = arith.divf %4, %5 : vector<16x1xf32>
    %cst_4 = arith.constant 9.99999997E-7 : f32
    %7 = vector.broadcast %cst_4 : f32 to vector<16x1xf32>
    %8 = arith.addf %6, %7 : vector<16x1xf32>
    %9 = math.rsqrt %8 : vector<16x1xf32>
    %10 = vector.broadcast %9 : vector<16x1xf32> to vector<16x32xf32>
    %11 = arith.mulf %0, %10 : vector<16x32xf32>
    %12 = vector.broadcast %1 : vector<1x32xf32> to vector<16x32xf32>
    %13 = arith.mulf %11, %12 : vector<16x32xf32>
    %c0_5 = arith.constant 0 : index
    %c0_6 = arith.constant 0 : index
    %14 = vector.load %arg4[%c0_5, %c0_6] : memref<32x64xbf16, #tpu.memory_space<vmem>>, vector<32x64xbf16>
    %15 = arith.truncf %13 : vector<16x32xf32> to vector<16x32xbf16>
    %cst_7 = arith.constant dense<0.000000e+00> : vector<16x64xf32>
    %16 = tpu.matmul %15, %14, %cst_7 {dimension_numbers = #tpu.dot_dimension_numbers<[1], [0], [0], [1], [0, 0, 1, 1], [], []>} : vector<16x32xbf16>, vector<32x64xbf16>, vector<16x64xf32> -> vector<16x64xf32>
    %17 = vector.extract_strided_slice %16 {offsets = [0, 0], sizes = [16, 48], strides = [1, 1]} : vector<16x64xf32> to vector<16x48xf32>
    %c0_8 = arith.constant 0 : index
    %c0_9 = arith.constant 0 : index
    %18 = vector.load %arg9[%c0_8, %c0_9] : memref<16x48xf32, #tpu.memory_space<vmem>>, vector<16x48xf32>
    %19 = arith.mulf %17, %18 : vector<16x48xf32>
    %c0_10 = arith.constant 0 : index
    %c0_11 = arith.constant 0 : index
    %20 = vector.load %arg8[%c0_10, %c0_11] : memref<48x48xbf16, #tpu.memory_space<vmem>>, vector<48x48xbf16>
    %21 = arith.truncf %17 : vector<16x48xf32> to vector<16x48xbf16>
    %cst_12 = arith.constant dense<0.000000e+00> : vector<16x48xf32>
    %22 = tpu.matmul %21, %20, %cst_12 {dimension_numbers = #tpu.dot_dimension_numbers<[1], [0], [0], [1], [0, 0, 1, 1], [], []>} : vector<16x48xbf16>, vector<48x48xbf16>, vector<16x48xf32> -> vector<16x48xf32>
    %c0_13 = arith.constant 0 : index
    %c0_14 = arith.constant 0 : index
    %23 = vector.load %arg10[%c0_13, %c0_14] : memref<16x48xf32, #tpu.memory_space<vmem>>, vector<16x48xf32>
    %24 = arith.mulf %22, %23 : vector<16x48xf32>
    %25 = arith.addf %19, %24 : vector<16x48xf32>
    %c0_15 = arith.constant 0 : index
    %c0_16 = arith.constant 0 : index
    %26 = vector.load %arg1[%c0_15, %c0_16] : memref<16x16xf32, #tpu.memory_space<vmem>>, vector<16x16xf32>
    %c0_17 = arith.constant 0 : index
    %c0_18 = arith.constant 0 : index
    %27 = vector.load %arg5[%c0_17, %c0_18] : memref<32x32xbf16, #tpu.memory_space<vmem>>, vector<32x32xbf16>
    %cst_19 = arith.constant 0.000000e+00 : f32
    %28 = vector.broadcast %cst_19 : f32 to vector<16x32xf32>
    %29 = vector.extract_strided_slice %25 {offsets = [0, 32], sizes = [16, 8], strides = [1, 1]} : vector<16x48xf32> to vector<16x8xf32>
    %30 = arith.truncf %29 : vector<16x8xf32> to vector<16x8xbf16>
    %31 = vector.extract_strided_slice %16 {offsets = [0, 48], sizes = [16, 8], strides = [1, 1]} : vector<16x64xf32> to vector<16x8xf32>
    %32 = arith.truncf %31 : vector<16x8xf32> to vector<16x8xbf16>
    %33 = vector.extract_strided_slice %25 {offsets = [0, 0], sizes = [16, 8], strides = [1, 1]} : vector<16x48xf32> to vector<16x8xf32>
    %34 = arith.truncf %33 : vector<16x8xf32> to vector<16x8xbf16>
    %cst_20 = arith.constant dense<0.000000e+00> : vector<16x16xf32>
    %35 = tpu.matmul %34, %30, %cst_20 {dimension_numbers = #tpu.dot_dimension_numbers<[1], [1], [0], [0], [0, 0, 1, 0], [], []>} : vector<16x8xbf16>, vector<16x8xbf16>, vector<16x16xf32> -> vector<16x16xf32>
    %36 = arith.addf %35, %26 : vector<16x16xf32>
    %cst_21 = arith.constant dense<0xFF800000> : vector<16xf32>
    %37 = vector.multi_reduction <maximumf>, %36, %cst_21 [1] : vector<16x16xf32> to vector<16xf32>
    %38 = vector.shape_cast %37 : vector<16xf32> to vector<16x1xf32>
    %39 = vector.broadcast %38 : vector<16x1xf32> to vector<16x16xf32>
    %40 = arith.subf %36, %39 : vector<16x16xf32>
    %41 = math.exp %40 : vector<16x16xf32>
    %cst_22 = arith.constant dense<0.000000e+00> : vector<16xf32>
    %42 = vector.multi_reduction <add>, %41, %cst_22 [1] : vector<16x16xf32> to vector<16xf32>
    %43 = vector.shape_cast %42 : vector<16xf32> to vector<16x1xf32>
    %44 = vector.broadcast %43 : vector<16x1xf32> to vector<16x16xf32>
    %45 = arith.divf %41, %44 : vector<16x16xf32>
    %46 = arith.truncf %45 : vector<16x16xf32> to vector<16x16xbf16>
    %cst_23 = arith.constant dense<0.000000e+00> : vector<16x8xf32>
    %47 = tpu.matmul %46, %32, %cst_23 {dimension_numbers = #tpu.dot_dimension_numbers<[1], [0], [0], [1], [0, 0, 1, 1], [], []>} : vector<16x16xbf16>, vector<16x8xbf16>, vector<16x8xf32> -> vector<16x8xf32>
    %48 = arith.truncf %47 : vector<16x8xf32> to vector<16x8xbf16>
    %49 = vector.extract_strided_slice %27 {offsets = [0, 0], sizes = [8, 32], strides = [1, 1]} : vector<32x32xbf16> to vector<8x32xbf16>
    %cst_24 = arith.constant dense<0.000000e+00> : vector<16x32xf32>
    %50 = tpu.matmul %48, %49, %cst_24 {dimension_numbers = #tpu.dot_dimension_numbers<[1], [0], [0], [1], [0, 0, 1, 1], [], []>} : vector<16x8xbf16>, vector<8x32xbf16>, vector<16x32xf32> -> vector<16x32xf32>
    %51 = arith.addf %28, %50 : vector<16x32xf32>
    %52 = vector.extract_strided_slice %25 {offsets = [0, 8], sizes = [16, 8], strides = [1, 1]} : vector<16x48xf32> to vector<16x8xf32>
    %53 = arith.truncf %52 : vector<16x8xf32> to vector<16x8xbf16>
    %cst_25 = arith.constant dense<0.000000e+00> : vector<16x16xf32>
    %54 = tpu.matmul %53, %30, %cst_25 {dimension_numbers = #tpu.dot_dimension_numbers<[1], [1], [0], [0], [0, 0, 1, 0], [], []>} : vector<16x8xbf16>, vector<16x8xbf16>, vector<16x16xf32> -> vector<16x16xf32>
    %55 = arith.addf %54, %26 : vector<16x16xf32>
    %cst_26 = arith.constant dense<0xFF800000> : vector<16xf32>
    %56 = vector.multi_reduction <maximumf>, %55, %cst_26 [1] : vector<16x16xf32> to vector<16xf32>
    %57 = vector.shape_cast %56 : vector<16xf32> to vector<16x1xf32>
    %58 = vector.broadcast %57 : vector<16x1xf32> to vector<16x16xf32>
    %59 = arith.subf %55, %58 : vector<16x16xf32>
    %60 = math.exp %59 : vector<16x16xf32>
    %cst_27 = arith.constant dense<0.000000e+00> : vector<16xf32>
    %61 = vector.multi_reduction <add>, %60, %cst_27 [1] : vector<16x16xf32> to vector<16xf32>
    %62 = vector.shape_cast %61 : vector<16xf32> to vector<16x1xf32>
    %63 = vector.broadcast %62 : vector<16x1xf32> to vector<16x16xf32>
    %64 = arith.divf %60, %63 : vector<16x16xf32>
    %65 = arith.truncf %64 : vector<16x16xf32> to vector<16x16xbf16>
    %cst_28 = arith.constant dense<0.000000e+00> : vector<16x8xf32>
    %66 = tpu.matmul %65, %32, %cst_28 {dimension_numbers = #tpu.dot_dimension_numbers<[1], [0], [0], [1], [0, 0, 1, 1], [], []>} : vector<16x16xbf16>, vector<16x8xbf16>, vector<16x8xf32> -> vector<16x8xf32>
    %67 = arith.truncf %66 : vector<16x8xf32> to vector<16x8xbf16>
    %68 = vector.extract_strided_slice %27 {offsets = [8, 0], sizes = [8, 32], strides = [1, 1]} : vector<32x32xbf16> to vector<8x32xbf16>
    %cst_29 = arith.constant dense<0.000000e+00> : vector<16x32xf32>
    %69 = tpu.matmul %67, %68, %cst_29 {dimension_numbers = #tpu.dot_dimension_numbers<[1], [0], [0], [1], [0, 0, 1, 1], [], []>} : vector<16x8xbf16>, vector<8x32xbf16>, vector<16x32xf32> -> vector<16x32xf32>
    %70 = arith.addf %51, %69 : vector<16x32xf32>
    %71 = vector.extract_strided_slice %25 {offsets = [0, 40], sizes = [16, 8], strides = [1, 1]} : vector<16x48xf32> to vector<16x8xf32>
    %72 = arith.truncf %71 : vector<16x8xf32> to vector<16x8xbf16>
    %73 = vector.extract_strided_slice %16 {offsets = [0, 56], sizes = [16, 8], strides = [1, 1]} : vector<16x64xf32> to vector<16x8xf32>
    %74 = arith.truncf %73 : vector<16x8xf32> to vector<16x8xbf16>
    %75 = vector.extract_strided_slice %25 {offsets = [0, 16], sizes = [16, 8], strides = [1, 1]} : vector<16x48xf32> to vector<16x8xf32>
    %76 = arith.truncf %75 : vector<16x8xf32> to vector<16x8xbf16>
    %cst_30 = arith.constant dense<0.000000e+00> : vector<16x16xf32>
    %77 = tpu.matmul %76, %72, %cst_30 {dimension_numbers = #tpu.dot_dimension_numbers<[1], [1], [0], [0], [0, 0, 1, 0], [], []>} : vector<16x8xbf16>, vector<16x8xbf16>, vector<16x16xf32> -> vector<16x16xf32>
    %78 = arith.addf %77, %26 : vector<16x16xf32>
    %cst_31 = arith.constant dense<0xFF800000> : vector<16xf32>
    %79 = vector.multi_reduction <maximumf>, %78, %cst_31 [1] : vector<16x16xf32> to vector<16xf32>
    %80 = vector.shape_cast %79 : vector<16xf32> to vector<16x1xf32>
    %81 = vector.broadcast %80 : vector<16x1xf32> to vector<16x16xf32>
    %82 = arith.subf %78, %81 : vector<16x16xf32>
    %83 = math.exp %82 : vector<16x16xf32>
    %cst_32 = arith.constant dense<0.000000e+00> : vector<16xf32>
    %84 = vector.multi_reduction <add>, %83, %cst_32 [1] : vector<16x16xf32> to vector<16xf32>
    %85 = vector.shape_cast %84 : vector<16xf32> to vector<16x1xf32>
    %86 = vector.broadcast %85 : vector<16x1xf32> to vector<16x16xf32>
    %87 = arith.divf %83, %86 : vector<16x16xf32>
    %88 = arith.truncf %87 : vector<16x16xf32> to vector<16x16xbf16>
    %cst_33 = arith.constant dense<0.000000e+00> : vector<16x8xf32>
    %89 = tpu.matmul %88, %74, %cst_33 {dimension_numbers = #tpu.dot_dimension_numbers<[1], [0], [0], [1], [0, 0, 1, 1], [], []>} : vector<16x16xbf16>, vector<16x8xbf16>, vector<16x8xf32> -> vector<16x8xf32>
    %90 = arith.truncf %89 : vector<16x8xf32> to vector<16x8xbf16>
    %91 = vector.extract_strided_slice %27 {offsets = [16, 0], sizes = [8, 32], strides = [1, 1]} : vector<32x32xbf16> to vector<8x32xbf16>
    %cst_34 = arith.constant dense<0.000000e+00> : vector<16x32xf32>
    %92 = tpu.matmul %90, %91, %cst_34 {dimension_numbers = #tpu.dot_dimension_numbers<[1], [0], [0], [1], [0, 0, 1, 1], [], []>} : vector<16x8xbf16>, vector<8x32xbf16>, vector<16x32xf32> -> vector<16x32xf32>
    %93 = arith.addf %70, %92 : vector<16x32xf32>
    %94 = vector.extract_strided_slice %25 {offsets = [0, 24], sizes = [16, 8], strides = [1, 1]} : vector<16x48xf32> to vector<16x8xf32>
    %95 = arith.truncf %94 : vector<16x8xf32> to vector<16x8xbf16>
    %cst_35 = arith.constant dense<0.000000e+00> : vector<16x16xf32>
    %96 = tpu.matmul %95, %72, %cst_35 {dimension_numbers = #tpu.dot_dimension_numbers<[1], [1], [0], [0], [0, 0, 1, 0], [], []>} : vector<16x8xbf16>, vector<16x8xbf16>, vector<16x16xf32> -> vector<16x16xf32>
    %97 = arith.addf %96, %26 : vector<16x16xf32>
    %cst_36 = arith.constant dense<0xFF800000> : vector<16xf32>
    %98 = vector.multi_reduction <maximumf>, %97, %cst_36 [1] : vector<16x16xf32> to vector<16xf32>
    %99 = vector.shape_cast %98 : vector<16xf32> to vector<16x1xf32>
    %100 = vector.broadcast %99 : vector<16x1xf32> to vector<16x16xf32>
    %101 = arith.subf %97, %100 : vector<16x16xf32>
    %102 = math.exp %101 : vector<16x16xf32>
    %cst_37 = arith.constant dense<0.000000e+00> : vector<16xf32>
    %103 = vector.multi_reduction <add>, %102, %cst_37 [1] : vector<16x16xf32> to vector<16xf32>
    %104 = vector.shape_cast %103 : vector<16xf32> to vector<16x1xf32>
    %105 = vector.broadcast %104 : vector<16x1xf32> to vector<16x16xf32>
    %106 = arith.divf %102, %105 : vector<16x16xf32>
    %107 = arith.truncf %106 : vector<16x16xf32> to vector<16x16xbf16>
    %cst_38 = arith.constant dense<0.000000e+00> : vector<16x8xf32>
    %108 = tpu.matmul %107, %74, %cst_38 {dimension_numbers = #tpu.dot_dimension_numbers<[1], [0], [0], [1], [0, 0, 1, 1], [], []>} : vector<16x16xbf16>, vector<16x8xbf16>, vector<16x8xf32> -> vector<16x8xf32>
    %109 = arith.truncf %108 : vector<16x8xf32> to vector<16x8xbf16>
    %110 = vector.extract_strided_slice %27 {offsets = [24, 0], sizes = [8, 32], strides = [1, 1]} : vector<32x32xbf16> to vector<8x32xbf16>
    %cst_39 = arith.constant dense<0.000000e+00> : vector<16x32xf32>
    %111 = tpu.matmul %109, %110, %cst_39 {dimension_numbers = #tpu.dot_dimension_numbers<[1], [0], [0], [1], [0, 0, 1, 1], [], []>} : vector<16x8xbf16>, vector<8x32xbf16>, vector<16x32xf32> -> vector<16x32xf32>
    %112 = arith.addf %93, %111 : vector<16x32xf32>
    %113 = arith.addf %0, %112 : vector<16x32xf32>
    %c0_40 = arith.constant 0 : index
    %c0_41 = arith.constant 0 : index
    %114 = vector.load %arg3[%c0_40, %c0_41] : memref<1x32xf32, #tpu.memory_space<vmem>>, vector<1x32xf32>
    %115 = arith.mulf %113, %113 : vector<16x32xf32>
    %cst_42 = arith.constant dense<0.000000e+00> : vector<16xf32>
    %116 = vector.multi_reduction <add>, %115, %cst_42 [1] : vector<16x32xf32> to vector<16xf32>
    %117 = vector.shape_cast %116 : vector<16xf32> to vector<16x1xf32>
    %cst_43 = arith.constant 3.200000e+01 : f32
    %118 = vector.broadcast %cst_43 : f32 to vector<16x1xf32>
    %119 = arith.divf %117, %118 : vector<16x1xf32>
    %cst_44 = arith.constant 9.99999997E-7 : f32
    %120 = vector.broadcast %cst_44 : f32 to vector<16x1xf32>
    %121 = arith.addf %119, %120 : vector<16x1xf32>
    %122 = math.rsqrt %121 : vector<16x1xf32>
    %123 = vector.broadcast %122 : vector<16x1xf32> to vector<16x32xf32>
    %124 = arith.mulf %113, %123 : vector<16x32xf32>
    %125 = vector.broadcast %114 : vector<1x32xf32> to vector<16x32xf32>
    %126 = arith.mulf %124, %125 : vector<16x32xf32>
    %c0_45 = arith.constant 0 : index
    %c0_46 = arith.constant 0 : index
    %127 = vector.load %arg6[%c0_45, %c0_46] : memref<32x128xbf16, #tpu.memory_space<vmem>>, vector<32x128xbf16>
    %128 = arith.truncf %126 : vector<16x32xf32> to vector<16x32xbf16>
    %cst_47 = arith.constant dense<0.000000e+00> : vector<16x128xf32>
    %129 = tpu.matmul %128, %127, %cst_47 {dimension_numbers = #tpu.dot_dimension_numbers<[1], [0], [0], [1], [0, 0, 1, 1], [], []>} : vector<16x32xbf16>, vector<32x128xbf16>, vector<16x128xf32> -> vector<16x128xf32>
    %130 = vector.extract_strided_slice %129 {offsets = [0, 0], sizes = [16, 64], strides = [1, 1]} : vector<16x128xf32> to vector<16x64xf32>
    %131 = vector.extract_strided_slice %129 {offsets = [0, 64], sizes = [16, 64], strides = [1, 1]} : vector<16x128xf32> to vector<16x64xf32>
    %132 = arith.negf %130 : vector<16x64xf32>
    %133 = math.exp %132 : vector<16x64xf32>
    %cst_48 = arith.constant 1.000000e+00 : f32
    %134 = vector.broadcast %cst_48 : f32 to vector<16x64xf32>
    %135 = arith.addf %134, %133 : vector<16x64xf32>
    %136 = arith.divf %134, %135 : vector<16x64xf32>
    %137 = arith.mulf %130, %136 : vector<16x64xf32>
    %138 = arith.mulf %137, %131 : vector<16x64xf32>
    %c0_49 = arith.constant 0 : index
    %c0_50 = arith.constant 0 : index
    %139 = vector.load %arg7[%c0_49, %c0_50] : memref<64x32xbf16, #tpu.memory_space<vmem>>, vector<64x32xbf16>
    %140 = arith.truncf %138 : vector<16x64xf32> to vector<16x64xbf16>
    %cst_51 = arith.constant dense<0.000000e+00> : vector<16x32xf32>
    %141 = tpu.matmul %140, %139, %cst_51 {dimension_numbers = #tpu.dot_dimension_numbers<[1], [0], [0], [1], [0, 0, 1, 1], [], []>} : vector<16x64xbf16>, vector<64x32xbf16>, vector<16x32xf32> -> vector<16x32xf32>
    %142 = arith.addf %113, %141 : vector<16x32xf32>
    %c0_52 = arith.constant 0 : index
    %c0_53 = arith.constant 0 : index
    %143 = vector.load %arg11[%c0_52, %c0_53] : memref<16x32xf32, #tpu.memory_space<vmem>>, vector<16x32xf32>
    tpu.vector_store %arg11[%c0_52, %c0_53], %142 {strides = array<i32>} : memref<16x32xf32, #tpu.memory_space<vmem>>, vector<16x32xf32>,
    return
  }
}

</mosaic_0001>

<bundles_post_ra>
// kernel: decoder_layer.1
= control target key start
LH: loop header
LB: loop body
LE: loop exit
PB: predicated region body
PF: predicated region fallthrough
CT: control target
= control target key end

     0   :  { %vm45_vm0 = vcmask 261120   ;;  %s1682_s0 = inlined_call_operand.vmem [shape: f32[16,32], index: 0, kind: input, shape index: {}]   ;;  %s1683_s1 = inlined_call_operand.vmem [shape: f32[16,16], index: 1, kind: input, shape index: {}]   ;;  %s1684_s2 = inlined_call_operand.vmem [shape: f32[1,32], index: 2, kind: input, shape index: {}]   ;;  %s1685_s3 = inlined_call_operand.vmem [shape: f32[1,32], index: 3, kind: input, shape index: {}]   ;;  %s1686_s4 = inlined_call_operand.vmem [shape: bf16[32,64], index: 4, kind: input, shape index: {}]   ;;  %s1687_s5 = inlined_call_operand.vmem [shape: bf16[32,32], index: 5, kind: input, shape index: {}]   ;;  %s1688_s6 = inlined_call_operand.vmem [shape: bf16[32,128], index: 6, kind: input, shape index: {}]   ;;  %s1689_s7 = inlined_call_operand.vmem [shape: bf16[64,32], index: 7, kind: input, shape index: {}]   ;;  %s1690_s8 = inlined_call_operand.vmem [shape: bf16[48,48], index: 8, kind: input, shape index: {}]   ;;  %s1691_s9 = inlined_call_operand.vmem [shape: f32[16,48], index: 9, kind: input, shape index: {}]   ;;  %s1692_s10 = inlined_call_operand.vmem [shape: f32[16,48], index: 10, kind: input, shape index: {}]   ;;  %s1693_s11 = inlined_call_operand.hbm [shape: f32[16,32], index: 11, kind: output, shape index: {}]  }
   0x1   :  { %v1446_v0 = vld [vmem:[%s1682_s0] sm:$0xff]  ;;  %v1451_v1 = vld [vmem:[%s1682_s0 + $0x8] sm:$0xff] }
   0x2   :  { %v43_v2 = vmul.f32 %v1446_v0, %v1446_v0  ;;  %v44_v3 = vmul.f32 %v1451_v1, %v1451_v1 }
   0x4   :  { %v46_v4 = vsel %vm45_vm0, %v43_v2, 0.0  ;;  %v49_v5 = vsel %vm45_vm0, %v44_v3, 0.0 }
   0x5   :  { %47 = vadd.xlane.f32.xlu0 %v46_v4 }
   0x9   :  { %50 = vadd.xlane.f32.xlu0 %v49_v5 }
   0xa   :  { %16 = vsyncpa [#allocation3], 0  ;;  %v1287_v6 = vld [vmem:[%s1686_s4] sm:$0xff]   ;;  %v1370_v7 = vmov 0.0   ;;  %vm1371_vm1 = vmmov 0   ;;  %v1288_v8 = vld [vmem:[%s1686_s4 + $0x8] sm:$0xff]  }
   0xb   :  { %1164 = vmatprep.subr.bf16.mxu0 %v1370_v7  ;;  %1168 = vmatprep.mubr.msk.bf16.mxu0 %vm1371_vm1, %v1370_v7  ;;  %v1289_v9 = vld [vmem:[%s1690_s8] sm:$0xff]   ;;  %v1290_v10 = vld [vmem:[%s1690_s8 + $0x8] sm:$0xff]   ;;  %v1291_v25 = vld [vmem:[%s1690_s8 + $0x10] sm:$0xff]   ;;  %vm159_vm2 = vcmask 392192   ;;  %s1372_s18 = smov 96   ;;  %vm220_vm3 = vcmask 64512  }
   0xc   :  { %1165 = vmatpush3.bf16.msra.mxu0 %v1287_v6  ;;  %1172 = vmatprep.subr.bf16.mxu1 %v1370_v7  ;;  %v1094_v20 = vld [vmem:[%s1684_s2] ss:$0 sm:$0xff]  ;;  %v131_v33 = vld [vmem:[%s1691_s9 + $0x8] sm:$0xff]  ;;  %vm268_vm4 = vcmask 130048   ;;  %s1373_s21 = smov 120   ;;  %s1375_s22 = smov 112  }
   0xd   :  { %1166 = vmatprep.subr.bf16.mxu0 %v1370_v7  ;;  %1178 = vmatprep.mubr.msk.bf16.mxu1 %vm1371_vm1, %v1370_v7  ;;  %v130_v31 = vld [vmem:[%s1691_s9] sm:$0xff]  ;;  %v205_v35 = vld [vmem:[%s1692_s10 + $0x8] sm:$0xff]  ;;  %s1376_s0 = smov 88   ;;  %vm458_vm5 = vcmask 1043456   ;;  %s1377_s27 = smov 104   ;;  %vm1029_vm6 = vcmask 523264  }
   0xe   :  { %1173 = vmatpush3.bf16.msra.mxu1 %v1289_v9  ;;  %v204_v32 = vld [vmem:[%s1692_s10] sm:$0xff]  ;;  %v1527_v50 = vld [vmem:[%s1683_s1 + $0x8] sm:$0xff]  ;;  %s1378_s4 = smov 72   ;;  %s1379_s20 = smov 64  }
   0xf   :  { %1174 = vmatprep.subr.bf16.mxu1 %v1370_v7  ;;  %v1522_v48 = vld [vmem:[%s1683_s1] sm:$0xff]  ;;  %s1374_s1 = smov 80  }
  0x10   :  { %1167 = vmatpush3.bf16.msra.mxu0 %v1288_v8 }
  0x11   :  { %1182 = vmatprep.subr.bf16.mxu0 %v1370_v7 }
  0x12   :  { %1175 = vmatpush3.bf16.msra.mxu1 %v1290_v10 }
  0x13   :  { %1176 = vmatprep.subr.bf16.mxu1 %v1370_v7 }
  0x16   :  { %1177 = vmatpush3.bf16.msra.mxu1 %v1291_v25 }
  0x17   :  { %1200 = vmatprep.subr.bf16.mxu1 %v1370_v7 }
  0x92   :  { %v48_v11 = vpop.xlane.xlu0 %47 }
  0x93   :  { %v53_v12 = vmul.f32 0.03125, %v48_v11 }
  0x95   :  { %v55_v13 = vadd.f32 1e-06, %v53_v12 }
  0x96   :  { %v51_v14 = vpop.xlane.xlu0 %50 }
  0x97   :  { %1298 = vrsqrt.f32 %v55_v13  ;;  %v54_v15 = vmul.f32 0.03125, %v51_v14 }
  0x99   :  { %v56_v16 = vadd.f32 1e-06, %v54_v15 }
  0x9b   :  { %1300 = vrsqrt.f32 %v56_v16 }
  0xa1   :  { %v1299_v17 = vpop.eup %1298 }
  0xa2   :  { %v59_v18 = vmul.f32 %v1299_v17, %v1446_v0 }
  0xa4   :  { %v67_v22 = vmul.f32 %v1094_v20, %v59_v18 }
  0xa5   :  { %v1301_v19 = vpop.eup %1300 }
  0xa6   :  { %v60_v21 = vmul.f32 %v1301_v19, %v1451_v1 }
  0xa8   :  { %v68_v23 = vmul.f32 %v1094_v20, %v60_v21 }
  0xaa   :  { %v73_v24 = vpack.c.bf16 %v68_v23, %v67_v22 }
  0xac   :  { %1169 = vmatmul.mubr.msk.bf16.vlgmr.msra.gmra.mrb[0].mxu0 %vm45_vm0, %v73_v24 }
  0xad   :  { %1184 = vmatprep.mubr.msk.bf16.mxu0 %vm1371_vm1, %v1370_v7 }
 0x17f   :  { %v123_v26 = vpop.f32.mrb[0].mxu0 }
 0x180   :  { %v1170_v27 = vpop.f32.mrb[1].mxu0  ;;  %v132_v36 = vmul.f32 %v130_v31, %v123_v26 }
 0x181   :  { %v126_v28 = vpop.f32.mrb[2].mxu0 }
 0x182   :  { %v1493_v29 = vpack.c.bf16 %v126_v28, %v123_v26  ;;  %v1171_v30 = vpop.f32.mrb[3].mxu0  ;;  %v133_v40 = vmul.f32 %v131_v33, %v126_v28 }
 0x184   :  { %1179 = vmatmul.mubr.msk.bf16.vlgmr.msra.gmra.mrb[0].mxu1 %vm159_vm2, %v1493_v29 }
 0x185   :  { %1202 = vmatprep.mubr.msk.bf16.mxu1 %vm1371_vm1, %v1370_v7 }
 0x257   :  { %v197_v34 = vpop.f32.mrb[0].mxu1 }
 0x258   :  { %v206_v37 = vmul.f32 %v204_v32, %v197_v34  ;;  %v1180_v38 = vpop.f32.mrb[1].mxu1 }
 0x259   :  { %v200_v39 = vpop.f32.mrb[2].mxu1 }
 0x25a   :  { %v208_v41 = vadd.f32 %v206_v37, %v132_v36  ;;  %v207_v42 = vmul.f32 %v205_v35, %v200_v39  ;;  %v1181_v43 = vpop.f32.mrb[3].mxu1 }
 0x25c   :  { %v209_v44 = vadd.f32 %v207_v42, %v133_v40  ;;  %v213_v40 = vld [vmem:[%s1687_s5 + $0x4] sm:$0xf] }
 0x25e   :  { %v1510_v45 = vpack.c.bf16 %v209_v44, %v208_v41  ;;  %v460_v41 = vsel %vm458_vm5, %v213_v40, 0 }
 0x260   :  { %218 = vrot.lane.b32.xlu1 %v1510_v45, %s1372_s18 }
 0x2d2   :  { %v219_v46 = vpop.permute.xlu1 %218 }
 0x2d3   :  { %v225_v47 = vsel %vm220_vm3, %v219_v46, 0 }
 0x2d4   :  { %1183 = vmatpush3.bf16.xpose.msra.mxu0 %v225_v47 }
 0x2d5   :  { %1188 = vmatprep.subr.bf16.mxu0 %v1370_v7 }
 0x2db   :  { %1185 = vmatmul.mubr.msk.bf16.vlgmr.msra.gmra.mrb[4].mxu0 %vm220_vm3, %v1510_v45 }
 0x2dc   :  { %1190 = vmatprep.mubr.msk.bf16.mxu0 %vm1371_vm1, %v1370_v7 }
 0x3ae   :  { %v261_v49 = vpop.f32.mrb[4].mxu0 }
 0x3af   :  { %v262_v51 = vadd.f32 %v261_v49, %v1522_v48  ;;  %v1186_v52 = vpop.f32.mrb[5].mxu0 }
 0x3b0   :  { %v264_v53 = vpop.f32.mrb[6].mxu0 }
 0x3b1   :  { %v265_v54 = vadd.f32 %v264_v53, %v1527_v50  ;;  %v1187_v55 = vpop.f32.mrb[7].mxu0  ;;  %v269_v56 = vsel %vm268_vm4, %v262_v51, -inf }
 0x3b2   :  { %270 = vmax.xlane.f32.xlu1 %v269_v56 }
 0x3b3   :  { %v272_v57 = vsel %vm268_vm4, %v265_v54, -inf }
 0x3b4   :  { %273 = vmax.xlane.f32.xlu0 %v272_v57 }
 0x3c3   :  { %341 = vrot.lane.b32.xlu1 %v1510_v45, %s1373_s21 }
 0x43f   :  { %v271_v58 = vpop.xlane.xlu1 %270 }
 0x440   :  { %v275_v59 = vsub.f32 %v262_v51, %v271_v58 }
 0x441   :  { %v274_v60 = vpop.xlane.xlu0 %273 }
 0x442   :  { %v277_v61 = vmul.f32 1.442695, %v275_v59  ;;  %v276_v62 = vsub.f32 %v265_v54, %v274_v60 }
 0x443   :  { %v342_v15 = vpop.permute.xlu1 %341 }
 0x444   :  { %1302 = vpow2.f32 %v277_v61  ;;  %v279_v63 = vmul.f32 1.442695, %v276_v62 }
 0x446   :  { %1304 = vpow2.f32 %v279_v63 }
 0x44e   :  { %v1303_v2 = vpop.eup %1302 }
 0x44f   :  { %v281_v3 = vsel %vm268_vm4, %v1303_v2, 0.0 }
 0x450   :  { %v1305_v4 = vpop.eup %1304  ;;  %282 = vadd.xlane.f32.xlu0 %v281_v3 }
 0x451   :  { %v284_v5 = vsel %vm268_vm4, %v1305_v4, 0.0 }
 0x454   :  { %285 = vadd.xlane.f32.xlu0 %v284_v5 }
 0x46a   :  { %293 = vrot.lane.b32.xlu0 %v1493_v29, %s1374_s1 }
 0x4dd   :  { %v283_v6 = vpop.xlane.xlu0 %282 }
 0x4de   :  { %1306 = vrcp.f32 %v283_v6 }
 0x4e1   :  { %v286_v8 = vpop.xlane.xlu0 %285 }
 0x4e2   :  { %1308 = vrcp.f32 %v286_v8 }
 0x4e5   :  { %v294_v9 = vpop.permute.xlu0 %293 }
 0x4e6   :  { %1189 = vmatpush3.bf16.msra.mxu0 %v294_v9  ;;  %1201 = vmatpush3.bf16.msra.mxu1 %v294_v9 }
 0x4e7   :  { %1194 = vmatprep.subr.bf16.mxu0 %v1370_v7  ;;  %1212 = vmatprep.subr.bf16.mxu1 %v1370_v7 }
 0x4e8   :  { %v1307_v10 = vpop.eup %1306 }
 0x4e9   :  { %v288_v12 = vmul.f32 %v1307_v10, %v1303_v2 }
 0x4ec   :  { %v1309_v11 = vpop.eup %1308 }
 0x4ed   :  { %v290_v13 = vmul.f32 %v1309_v11, %v1305_v4 }
 0x4ef   :  { %v291_v14 = vpack.c.bf16 %v290_v13, %v288_v12 }
 0x4f1   :  { %1191 = vmatmul.mubr.msk.bf16.vlgmr.msra.gmra.mrb[8].mxu0 %vm268_vm4, %v291_v14 }
 0x4f2   :  { %1195 = vmatpush3.bf16.xpose.msra.mxu0 %v225_v47  ;;  %1196 = vmatprep.mubr.msk.bf16.mxu0 %vm1371_vm1, %v1370_v7  ;;  %v212_v47 = vld [vmem:[%s1687_s5] sm:$0xf] }
 0x4f3   :  { %1206 = vmatprep.subr.bf16.mxu0 %v1370_v7  ;;  %v507_v53 = vsel %vm458_vm5, %v212_v47, 0 }
 0x4f9   :  { %1197 = vmatmul.mubr.msk.bf16.vlgmr.msra.gmra.mrb[12].mxu0 %vm220_vm3, %v342_v15 }
 0x4fa   :  { %1208 = vmatprep.mubr.msk.bf16.mxu0 %vm1371_vm1, %v1370_v7  ;;  %1207 = vmatpush3.bf16.msra.mxu0 %v460_v41 }
 0x4fb   :  { %1218 = vmatprep.subr.bf16.mxu0 %v1370_v7 }
 0x5c4   :  { %v333_v16 = vpop.f32.mrb[8].mxu0 }
 0x5c5   :  { %v1192_v17 = vpop.f32.mrb[9].mxu0 }
 0x5c6   :  { %v336_v18 = vpop.f32.mrb[10].mxu0 }
 0x5c7   :  { %v340_v19 = vpack.c.bf16 %v336_v18, %v333_v16  ;;  %v1193_v20 = vpop.f32.mrb[11].mxu0 }
 0x5cc   :  { %v380_v21 = vpop.f32.mrb[12].mxu0 }
 0x5cd   :  { %v381_v22 = vadd.f32 %v380_v21, %v1522_v48  ;;  %v1198_v23 = vpop.f32.mrb[13].mxu0 }
 0x5ce   :  { %v383_v24 = vpop.f32.mrb[14].mxu0 }
 0x5cf   :  { %v384_v25 = vadd.f32 %v383_v24, %v1527_v50  ;;  %v1199_v26 = vpop.f32.mrb[15].mxu0  ;;  %v387_v27 = vsel %vm268_vm4, %v381_v22, -inf }
 0x5d0   :  { %388 = vmax.xlane.f32.xlu0 %v387_v27 }
 0x5d1   :  { %v390_v28 = vsel %vm268_vm4, %v384_v25, -inf }
 0x5d2   :  { %391 = vmax.xlane.f32.xlu1 %v390_v28 }
 0x5e3   :  { %550 = vrot.lane.b32.xlu1 %v1510_v45, %s1375_s22 }
 0x65d   :  { %v389_v30 = vpop.xlane.xlu0 %388 }
 0x65e   :  { %v393_v31 = vsub.f32 %v381_v22, %v389_v30 }
 0x65f   :  { %v392_v32 = vpop.xlane.xlu1 %391 }
 0x660   :  { %v395_v33 = vmul.f32 1.442695, %v393_v31  ;;  %v394_v34 = vsub.f32 %v384_v25, %v392_v32 }
 0x662   :  { %1310 = vpow2.f32 %v395_v33  ;;  %v397_v35 = vmul.f32 1.442695, %v394_v34 }
 0x663   :  { %v551_v3 = vpop.permute.xlu1 %550 }
 0x664   :  { %1312 = vpow2.f32 %v397_v35 }
 0x66c   :  { %v1311_v36 = vpop.eup %1310 }
 0x66d   :  { %v399_v37 = vsel %vm268_vm4, %v1311_v36, 0.0 }
 0x66e   :  { %v1313_v38 = vpop.eup %1312  ;;  %400 = vadd.xlane.f32.xlu0 %v399_v37  ;;  %v214_v37 = vld [vmem:[%s1687_s5 + $0x8] sm:$0xf] }
 0x66f   :  { %v402_v39 = vsel %vm268_vm4, %v1313_v38, 0.0 }
 0x672   :  { %403 = vadd.xlane.f32.xlu0 %v402_v39 }
 0x688   :  { %552 = vrot.lane.b32.xlu0 %v1510_v45, %s1376_s0 }
 0x6fb   :  { %v401_v42 = vpop.xlane.xlu0 %400 }
 0x6fc   :  { %1314 = vrcp.f32 %v401_v42 }
 0x6ff   :  { %v404_v43 = vpop.xlane.xlu0 %403 }
 0x700   :  { %1316 = vrcp.f32 %v404_v43 }
 0x703   :  { %v553_v56 = vpop.permute.xlu0 %552 }
 0x704   :  { %v558_v60 = vsel %vm220_vm3, %v553_v56, 0 }
 0x706   :  { %v1315_v44 = vpop.eup %1314 }
 0x707   :  { %v406_v49 = vmul.f32 %v1315_v44, %v1311_v36 }
 0x70a   :  { %v1317_v46 = vpop.eup %1316 }
 0x70b   :  { %v408_v51 = vmul.f32 %v1317_v46, %v1313_v38  ;;  %v676_v38 = vsel %vm458_vm5, %v214_v37, 0 }
 0x70d   :  { %v409_v52 = vpack.c.bf16 %v408_v51, %v406_v49 }
 0x70f   :  { %1203 = vmatmul.mubr.msk.bf16.vlgmr.msra.gmra.mrb[4].mxu1 %vm268_vm4, %v409_v52 }
 0x710   :  { %1213 = vmatpush3.bf16.msra.mxu1 %v507_v53  ;;  %1214 = vmatprep.mubr.msk.bf16.mxu1 %vm1371_vm1, %v1370_v7 }
 0x711   :  { %1224 = vmatprep.subr.bf16.mxu1 %v1370_v7 }
 0x717   :  { %1215 = vmatmul.mubr.msk.bf16.vlgmr.msra.gmra.mrb[8].mxu1 %vm220_vm3, %v340_v19 }
 0x718   :  { %1226 = vmatprep.mubr.msk.bf16.mxu1 %vm1371_vm1, %v1370_v7 }
 0x7e2   :  { %v447_v54 = vpop.f32.mrb[4].mxu1 }
 0x7e3   :  { %v1204_v55 = vpop.f32.mrb[5].mxu1 }
 0x7e4   :  { %v450_v57 = vpop.f32.mrb[6].mxu1 }
 0x7e5   :  { %v454_v58 = vpack.c.bf16 %v450_v57, %v447_v54  ;;  %v1205_v59 = vpop.f32.mrb[7].mxu1 }
 0x7e7   :  { %1209 = vmatmul.mubr.msk.bf16.vlgmr.msra.gmra.mrb[16].mxu0 %vm220_vm3, %v454_v58 }
 0x7e8   :  { %1219 = vmatpush3.bf16.xpose.msra.mxu0 %v558_v60  ;;  %1220 = vmatprep.mubr.msk.bf16.mxu0 %vm1371_vm1, %v1370_v7 }
 0x7e9   :  { %1230 = vmatprep.subr.bf16.mxu0 %v1370_v7 }
 0x7ea   :  { %v543_v61 = vpop.f32.mrb[8].mxu1 }
 0x7eb   :  { %v1216_v62 = vpop.f32.mrb[9].mxu1 }
 0x7ec   :  { %v546_v63 = vpop.f32.mrb[10].mxu1 }
 0x7ed   :  { %v1217_v2 = vpop.f32.mrb[11].mxu1 }
 0x7ef   :  { %1221 = vmatmul.mubr.msk.bf16.vlgmr.msra.gmra.mrb[20].mxu0 %vm220_vm3, %v551_v3 }
 0x7f0   :  { %1232 = vmatprep.mubr.msk.bf16.mxu0 %vm1371_vm1, %v1370_v7  ;;  %1231 = vmatpush3.bf16.msra.mxu0 %v676_v38 }
 0x7f1   :  { %1242 = vmatprep.subr.bf16.mxu0 %v1370_v7 }
 0x8ba   :  { %v496_v4 = vpop.f32.mrb[16].mxu0 }
 0x8bb   :  { %v1578_v5 = vadd.f32 %v543_v61, %v496_v4  ;;  %v1210_v6 = vpop.f32.mrb[17].mxu0 }
 0x8bc   :  { %v499_v8 = vpop.f32.mrb[18].mxu0 }
 0x8bd   :  { %v1580_v9 = vadd.f32 %v546_v63, %v499_v8  ;;  %v1211_v10 = vpop.f32.mrb[19].mxu0  ;;  %v215_v63 = vld [vmem:[%s1687_s5 + $0xc] sm:$0xf] }
 0x8be   :  { %v839_v2 = vsel %vm458_vm5, %v215_v63, 0 }
 0x8c2   :  { %v594_v11 = vpop.f32.mrb[20].mxu0 }
 0x8c3   :  { %v595_v12 = vadd.f32 %v594_v11, %v1522_v48  ;;  %v1222_v13 = vpop.f32.mrb[21].mxu0 }
 0x8c4   :  { %v597_v14 = vpop.f32.mrb[22].mxu0 }
 0x8c5   :  { %v598_v15 = vadd.f32 %v597_v14, %v1527_v50  ;;  %v1223_v16 = vpop.f32.mrb[23].mxu0  ;;  %v601_v17 = vsel %vm268_vm4, %v595_v12, -inf }
 0x8c6   :  { %602 = vmax.xlane.f32.xlu0 %v601_v17 }
 0x8c7   :  { %v604_v18 = vsel %vm268_vm4, %v598_v15, -inf }
 0x8c8   :  { %605 = vmax.xlane.f32.xlu1 %v604_v18 }
 0x8d9   :  { %721 = vrot.lane.b32.xlu1 %v1510_v45, %s1377_s27 }
 0x953   :  { %v603_v19 = vpop.xlane.xlu0 %602 }
 0x954   :  { %v607_v20 = vsub.f32 %v595_v12, %v603_v19 }
 0x955   :  { %v606_v21 = vpop.xlane.xlu1 %605 }
 0x956   :  { %v609_v22 = vmul.f32 1.442695, %v607_v20  ;;  %v608_v23 = vsub.f32 %v598_v15, %v606_v21 }
 0x958   :  { %1318 = vpow2.f32 %v609_v22  ;;  %v611_v24 = vmul.f32 1.442695, %v608_v23 }
 0x95a   :  { %1320 = vpow2.f32 %v611_v24 }
 0x962   :  { %v1319_v25 = vpop.eup %1318 }
 0x963   :  { %v613_v26 = vsel %vm268_vm4, %v1319_v25, 0.0 }
 0x964   :  { %v1321_v27 = vpop.eup %1320  ;;  %614 = vadd.xlane.f32.xlu0 %v613_v26 }
 0x965   :  { %v616_v28 = vsel %vm268_vm4, %v1321_v27, 0.0 }
 0x968   :  { %617 = vadd.xlane.f32.xlu0 %v616_v28 }
 0x97e   :  { %624 = vrot.lane.b32.xlu0 %v1493_v29, %s1378_s4  ;;  %v722_v29 = vpop.permute.xlu1 %721 }
 0x9f1   :  { %v615_v45 = vpop.xlane.xlu0 %614 }
 0x9f2   :  { %1322 = vrcp.f32 %v615_v45 }
 0x9f5   :  { %v618_v30 = vpop.xlane.xlu0 %617 }
 0x9f6   :  { %1324 = vrcp.f32 %v618_v30 }
 0x9f9   :  { %v625_v31 = vpop.permute.xlu0 %624 }
 0x9fa   :  { %1225 = vmatpush3.bf16.msra.mxu1 %v625_v31 }
 0x9fb   :  { %1236 = vmatprep.subr.bf16.mxu1 %v1370_v7 }
 0x9fc   :  { %v1323_v32 = vpop.eup %1322 }
 0x9fd   :  { %v620_v34 = vmul.f32 %v1323_v32, %v1319_v25 }
 0xa00   :  { %v1325_v33 = vpop.eup %1324 }
 0xa01   :  { %v622_v35 = vmul.f32 %v1325_v33, %v1321_v27 }
 0xa03   :  { %v623_v36 = vpack.c.bf16 %v622_v35, %v620_v34 }
 0xa05   :  { %1227 = vmatmul.mubr.msk.bf16.vlgmr.msra.gmra.mrb[12].mxu1 %vm268_vm4, %v623_v36 }
 0xa06   :  { %1237 = vmatpush3.bf16.xpose.msra.mxu1 %v558_v60  ;;  %1238 = vmatprep.mubr.msk.bf16.mxu1 %vm1371_vm1, %v1370_v7 }
 0xa07   :  { %1248 = vmatprep.subr.bf16.mxu1 %v1370_v7 }
 0xa0d   :  { %1239 = vmatmul.mubr.msk.bf16.vlgmr.msra.gmra.mrb[16].mxu1 %vm220_vm3, %v722_v29 }
 0xa0e   :  { %1250 = vmatprep.mubr.msk.bf16.mxu1 %vm1371_vm1, %v1370_v7  ;;  %1249 = vmatpush3.bf16.msra.mxu1 %v839_v2 }
 0xa0f   :  { %1262 = vmatprep.subr.bf16.mxu1 %v1370_v7 }
 0xad8   :  { %v664_v39 = vpop.f32.mrb[12].mxu1 }
 0xad9   :  { %v1228_v40 = vpop.f32.mrb[13].mxu1 }
 0xada   :  { %v667_v41 = vpop.f32.mrb[14].mxu1 }
 0xadb   :  { %v671_v42 = vpack.c.bf16 %v667_v41, %v664_v39  ;;  %v1229_v43 = vpop.f32.mrb[15].mxu1 }
 0xadd   :  { %1233 = vmatmul.mubr.msk.bf16.vlgmr.msra.gmra.mrb[24].mxu0 %vm220_vm3, %v671_v42  ;;  %v1114_v42 = vld [vmem:[%s1685_s3] ss:$0 sm:$0xff] }
 0xade   :  { %1243 = vmatpush3.bf16.msra.mxu0 %v625_v31  ;;  %1244 = vmatprep.mubr.msk.bf16.mxu0 %vm1371_vm1, %v1370_v7 }
 0xadf   :  { %1254 = vmatprep.subr.bf16.mxu0 %v1370_v7 }
 0xae0   :  { %v760_v44 = vpop.f32.mrb[16].mxu1 }
 0xae1   :  { %v761_v46 = vadd.f32 %v760_v44, %v1522_v48  ;;  %v1240_v47 = vpop.f32.mrb[17].mxu1 }
 0xae2   :  { %v763_v49 = vpop.f32.mrb[18].mxu1 }
 0xae3   :  { %v764_v51 = vadd.f32 %v763_v49, %v1527_v50  ;;  %v1241_v52 = vpop.f32.mrb[19].mxu1  ;;  %v767_v53 = vsel %vm268_vm4, %v761_v46, -inf  ;;  %v1294_v49 = vld [vmem:[%s1689_s7] sm:$0xff]  }
 0xae4   :  { %768 = vmax.xlane.f32.xlu1 %v767_v53  ;;  %v1296_v52 = vld [vmem:[%s1689_s7 + $0x10] sm:$0xff]   ;;  %v1297_v53 = vld [vmem:[%s1689_s7 + $0x18] sm:$0xff]  }
 0xae5   :  { %v770_v54 = vsel %vm268_vm4, %v764_v51, -inf }
 0xae6   :  { %771 = vmax.xlane.f32.xlu0 %v770_v54 }
 0xb71   :  { %v769_v55 = vpop.xlane.xlu1 %768 }
 0xb72   :  { %v773_v56 = vsub.f32 %v761_v46, %v769_v55 }
 0xb73   :  { %v772_v57 = vpop.xlane.xlu0 %771 }
 0xb74   :  { %v775_v58 = vmul.f32 1.442695, %v773_v56  ;;  %v774_v59 = vsub.f32 %v764_v51, %v772_v57  ;;  %v1295_v51 = vld [vmem:[%s1689_s7 + $0x8] sm:$0xff]   ;;  %s1380_s7 = smov [#allocation2]  }
 0xb75   :  { %s1083_s21 = sshll.u32 %s1380_s7, 4  ;;  %s1084_s21 = int_to_ptr.vmem [resolvable:$true] %s1083_s21 }
 0xb76   :  { %1326 = vpow2.f32 %v775_v58  ;;  %v777_v60 = vmul.f32 1.442695, %v774_v59  ;;  %s1346_s1 = scalar_lea.vmem %s1084_s21, 256  ;;  %p1351_p1 = scmp.lt.s32.totalorder %s1084_s21, %s1084_s21 }
 0xb77   :  { %p1347_p0 = scmp.ne.s32.totalorder %s1084_s21, %s1346_s1  ;;  %p1352_p2 = scmp.lt.s32.totalorder %s1346_s1, %s1346_s1 }
 0xb78   :  { %1328 = vpow2.f32 %v777_v60 }
 0xb79   :  { %p1353_p3 = por %p1352_p2, %p1351_p1 }
 0xb7b   :  { %p1354_p4 = pnand %p1353_p3, %p1347_p0 }
 0xb80   :  { %v1327_v48 = vpop.eup %1326 }
 0xb81   :  { %v779_v61 = vsel %vm268_vm4, %v1327_v48, 0.0 }
 0xb82   :  { %v1329_v62 = vpop.eup %1328  ;;  %780 = vadd.xlane.f32.xlu0 %v779_v61 }
 0xb83   :  { %v782_v50 = vsel %vm268_vm4, %v1329_v62, 0.0 }
 0xb86   :  { %783 = vadd.xlane.f32.xlu0 %v782_v50 }
 0xbb0   :  { %v712_v3 = vpop.f32.mrb[24].mxu0 }
 0xbb1   :  { %v719_v4 = vadd.f32 %v712_v3, %v1578_v5  ;;  %v1234_v6 = vpop.f32.mrb[25].mxu0 }
 0xbb2   :  { %v715_v8 = vpop.f32.mrb[26].mxu0 }
 0xbb3   :  { %v720_v10 = vadd.f32 %v715_v8, %v1580_v9  ;;  %v1235_v11 = vpop.f32.mrb[27].mxu0 }
 0xc0f   :  { %v781_v12 = vpop.xlane.xlu0 %780 }
 0xc10   :  { %1330 = vrcp.f32 %v781_v12 }
 0xc13   :  { %v784_v13 = vpop.xlane.xlu0 %783 }
 0xc14   :  { %1332 = vrcp.f32 %v784_v13 }
 0xc1a   :  { %v1331_v14 = vpop.eup %1330 }
 0xc1b   :  { %v786_v16 = vmul.f32 %v1331_v14, %v1327_v48 }
 0xc1e   :  { %v1333_v15 = vpop.eup %1332 }
 0xc1f   :  { %v788_v17 = vmul.f32 %v1333_v15, %v1329_v62 }
 0xc21   :  { %v789_v18 = vpack.c.bf16 %v788_v17, %v786_v16 }
 0xc23   :  { %1245 = vmatmul.mubr.msk.bf16.vlgmr.msra.gmra.mrb[28].mxu0 %vm268_vm4, %v789_v18 }
 0xc24   :  { %1258 = vmatprep.mubr.msk.bf16.mxu0 %vm1371_vm1, %v1370_v7 }
 0xcf6   :  { %v827_v5 = vpop.f32.mrb[28].mxu0 }
 0xcf7   :  { %v1246_v19 = vpop.f32.mrb[29].mxu0 }
 0xcf8   :  { %v830_v20 = vpop.f32.mrb[30].mxu0 }
 0xcf9   :  { %v834_v21 = vpack.c.bf16 %v830_v20, %v827_v5  ;;  %v1247_v9 = vpop.f32.mrb[31].mxu0 }
 0xcfb   :  { %1251 = vmatmul.mubr.msk.bf16.vlgmr.msra.gmra.mrb[20].mxu1 %vm220_vm3, %v834_v21 }
 0xcfc   :  { %1270 = vmatprep.mubr.msk.bf16.mxu1 %vm1371_vm1, %v1370_v7  ;;  %1263 = vmatpush3.bf16.msra.mxu1 %v1294_v49 }
 0xcfd   :  { %1264 = vmatprep.subr.bf16.mxu1 %v1370_v7 }
 0xd00   :  { %1265 = vmatpush3.bf16.msra.mxu1 %v1295_v51 }
 0xd01   :  { %1266 = vmatprep.subr.bf16.mxu1 %v1370_v7 }
 0xd04   :  { %1267 = vmatpush3.bf16.msra.mxu1 %v1296_v52 }
 0xd05   :  { %1268 = vmatprep.subr.bf16.mxu1 %v1370_v7 }
 0xd08   :  { %1269 = vmatpush3.bf16.msra.mxu1 %v1297_v53 }
 0xdce   :  { %v875_v22 = vpop.f32.mrb[20].mxu1 }
 0xdcf   :  { %v882_v23 = vadd.f32 %v875_v22, %v719_v4  ;;  %v1252_v24 = vpop.f32.mrb[21].mxu1 }
 0xdd0   :  { %v878_v25 = vpop.f32.mrb[22].mxu1 }
 0xdd1   :  { %v1627_v26 = vadd.f32 %v882_v23, %v1446_v0  ;;  %v883_v27 = vadd.f32 %v878_v25, %v720_v10  ;;  %v1253_v28 = vpop.f32.mrb[23].mxu1  ;;  %v1292_v0 = vld [vmem:[%s1688_s6] sm:$0xff]  }
 0xdd2   :  { %1255 = vmatpush3.bf16.msra.mxu0 %v1292_v0 }
 0xdd3   :  { %v1630_v45 = vadd.f32 %v883_v27, %v1451_v1  ;;  %v887_v30 = vmul.f32 %v1627_v26, %v1627_v26  ;;  %v1293_v1 = vld [vmem:[%s1688_s6 + $0x8] sm:$0xff]   ;;  %1256 = vmatprep.subr.bf16.mxu0 %v1370_v7 }
 0xdd5   :  { %v889_v31 = vsel %vm45_vm0, %v887_v30, 0.0  ;;  %v888_v32 = vmul.f32 %v1630_v45, %v1630_v45 }
 0xdd6   :  { %890 = vadd.xlane.f32.xlu1 %v889_v31  ;;  %1257 = vmatpush3.bf16.msra.mxu0 %v1293_v1 }
 0xdd7   :  { %v892_v33 = vsel %vm45_vm0, %v888_v32, 0.0 }
 0xdd8   :  { %893 = vadd.xlane.f32.xlu0 %v892_v33 }
 0xe63   :  { %v891_v34 = vpop.xlane.xlu1 %890 }
 0xe64   :  { %v895_v35 = vmul.f32 0.03125, %v891_v34 }
 0xe65   :  { %v894_v36 = vpop.xlane.xlu0 %893 }
 0xe66   :  { %v897_v29 = vadd.f32 1e-06, %v895_v35  ;;  %v896_v37 = vmul.f32 0.03125, %v894_v36 }
 0xe68   :  { %1334 = vrsqrt.f32 %v897_v29  ;;  %v898_v38 = vadd.f32 1e-06, %v896_v37 }
 0xe6a   :  { %1336 = vrsqrt.f32 %v898_v38 }
 0xe72   :  { %v1335_v39 = vpop.eup %1334 }
 0xe73   :  { %v901_v40 = vmul.f32 %v1335_v39, %v1627_v26 }
 0xe74   :  { %v1337_v41 = vpop.eup %1336 }
 0xe75   :  { %v902_v43 = vmul.f32 %v1337_v41, %v1630_v45  ;;  %v909_v44 = vmul.f32 %v1114_v42, %v901_v40 }
 0xe77   :  { %v910_v46 = vmul.f32 %v1114_v42, %v902_v43 }
 0xe79   :  { %v915_v47 = vpack.c.bf16 %v910_v46, %v909_v44 }
 0xe7b   :  { %1259 = vmatmul.mubr.msk.bf16.vlgmr.msra.gmra.mrb[32].mxu0 %vm45_vm0, %v915_v47 }
 0xf4e   :  { %v965_v54 = vpop.f32.mrb[32].mxu0 }
 0xf4f   :  { %988 = vrot.lane.b32.xlu1 %v965_v54, %s1379_s20  ;;  %v1260_v55 = vpop.f32.mrb[33].mxu0  ;;  %v1118_v58 = vmul.f32 -1.442695, %v965_v54 }
 0xf50   :  { %v968_v56 = vpop.f32.mrb[34].mxu0 }
 0xf51   :  { %990 = vrot.lane.b32.xlu0 %v968_v56, %s1379_s20  ;;  %v1261_v57 = vpop.f32.mrb[35].mxu0  ;;  %v1119_v59 = vmul.f32 -1.442695, %v968_v56  ;;  %1338 = vpow2.f32 %v1118_v58 }
 0xf53   :  { %1340 = vpow2.f32 %v1119_v59 }
 0xf5b   :  { %v1339_v60 = vpop.eup %1338 }
 0xf5c   :  { %v978_v61 = vadd.f32 1.0, %v1339_v60 }
 0xf5d   :  { %v1341_v48 = vpop.eup %1340 }
 0xf5e   :  { %v979_v7 = vadd.f32 1.0, %v1341_v48  ;;  %1342 = vrcp.f32 %v978_v61 }
 0xf60   :  { %1344 = vrcp.f32 %v979_v7 }
 0xf68   :  { %v1343_v62 = vpop.eup %1342 }
 0xf69   :  { %v984_v2 = vmul.f32 %v1343_v62, %v965_v54 }
 0xf6a   :  { %v1345_v50 = vpop.eup %1344 }
 0xf6b   :  { %v985_v3 = vmul.f32 %v1345_v50, %v968_v56 }
 0xfc1   :  { %v989_v63 = vpop.permute.xlu1 %988 }
 0xfc2   :  { %v994_v6 = vmul.f32 %v989_v63, %v984_v2 }
 0xfc3   :  { %v991_v4 = vpop.permute.xlu0 %990 }
 0xfc4   :  { %v995_v8 = vmul.f32 %v991_v4, %v985_v3 }
 0xfc6   :  { %v1004_v10 = vpack.c.bf16 %v995_v8, %v994_v6 }
 0xfc8   :  { %1271 = vmatmul.mubr.msk.bf16.vlgmr.msra.gmra.mrb[24].mxu1 %vm1029_vm6, %v1004_v10 }
0x109b   :  { %v1067_v11 = vpop.f32.mrb[24].mxu1 }
0x109c   :  { %v1074_v12 = vadd.f32 %v1067_v11, %v1627_v26  ;;  %v1272_v13 = vpop.f32.mrb[25].mxu1 }
0x109d   :  { %v1070_v14 = vpop.f32.mrb[26].mxu1 }
0x109e   :  { %1076 = vst.msk [vmem:[#allocation2] sm:$0xff] %vm45_vm0, %v1074_v12  ;;  %v1075_v15 = vadd.f32 %v1070_v14, %v1630_v45  ;;  %v1273_v16 = vpop.f32.mrb[27].mxu1 }
0x10a0   :  { %1077 = vst.msk [vmem:[#allocation2 + $0x8] sm:$0xff] %vm45_vm0, %v1075_v15 }
0x10a1   :  { %1357 = shalt.err (!%p1354_p4)
}
0x10a2   :  { %s1358_s23 = scalar_lea.hbm %s1693_s11, 256 }
0x10a3   :  { %p1359_p5 = scmp.ne.s32.totalorder %s1693_s11, %s1358_s23  ;;  %p1362_p6 = scmp.lt.u32.totalorder %s1358_s23, %s1693_s11 }
0x10a5   :  { %p1364_p7 = pnand %p1362_p6, %p1359_p5 }
0x10a7   :  { %1367 = shalt.err (!%p1364_p7)
}
0x10a8   :  { %s1381_s4 = smov 128   ;;  %s1382_s28 = smov 8  }
0x10a9   :  { %1089 = dma.vmem_to_hbm [thread:$0]  %s1084_s21, 256, %s1693_s11, [#allocation3], %s1381_s4, %s1381_s4, %s1382_s28  }
0x10aa   :  { %1368 = dma.done.wait [#allocation3], 256  }
0x10ab   :  { %1369 = vsyncadd [#allocation3], 4294967040 }
0x10ac   :  { %1093 = vsyncpa [#allocation3], 1 }

</bundles_post_ra>
